<compile_context>
chip_gen: v5e
topology: v5e:2x2
jax: 0.10.0
libtpu: 0.0.40
codegen_flags: <defaults>
</compile_context>

<pallas_src>
import functools

import jax
import jax.numpy as jnp
from jax import lax
from jax.experimental import pallas as pl
from jax.experimental.pallas import tpu as pltpu

LOG2E = 1.4426950408889634
MASK_VALUE = -1e30                      # finite: avoids exp(-inf - -inf) NaNs
_VMEM_LIMIT = 48 * 1024 * 1024          # safe on v5e/v6e (128 MiB) and v7x (64 MiB)


def _round_up(x, m):
    return (x + m - 1) // m * m


def _pick_tile(dim, candidates):
    """Largest lane/MXU-friendly candidate dividing `dim`, else the full dim
    (a full-extent block is always a legal BlockSpec)."""
    for c in candidates:
        if dim % c == 0:
            return c
    return dim


# ----------------------------------------------------------------------------
# Tiled linear:  y = x @ W + b,  x:(M,K)  W:(K,N)  b:(1,N)
# K kept whole (single block): no reduction grid axis, no accumulator scratch.
# Grid = (M//tm, N//tn) with j innermost so the x tile is fetched once per i.
# ----------------------------------------------------------------------------
def _linear_kernel(x_ref, w_ref, b_ref, o_ref):
    acc = jnp.dot(x_ref[...], w_ref[...], preferred_element_type=jnp.float32)
    o_ref[...] = (acc + b_ref[...].astype(jnp.float32)).astype(o_ref.dtype)


def linear(x, w, b, *, tm_max=512, tn_candidates=(512, 256, 128)):
    """x: (M, K), w: (K, N), b: (N,) -> (M, N)."""
    M, K = x.shape
    N = w.shape[1]
    # Pad M up to the tile size instead of degrading to tiny tiles for odd M.
    tm = min(tm_max, _round_up(M, 8))
    Mp = _round_up(M, tm)
    x_p = x if Mp == M else jnp.pad(x, ((0, Mp - M), (0, 0)))
    tn = _pick_tile(N, tn_candidates)
    # TODO(synk): re-introduce a K reduction grid axis (with f32 VMEM acc) for
    # very large K (> ~2k) where the (tm, K)/(K, tn) blocks stop fitting VMEM.
    b2 = b.reshape(1, N)
    out = pl.pallas_call(
        _linear_kernel,
        out_shape=jax.ShapeDtypeStruct((Mp, N), x.dtype),
        grid_spec=pltpu.PrefetchScalarGridSpec(
            num_scalar_prefetch=0,
            grid=(Mp // tm, N // tn),          # j innermost -> x block constant over j
            in_specs=[
                pl.BlockSpec((tm, K), lambda i, j: (i, 0)),
                pl.BlockSpec((K, tn), lambda i, j: (0, j)),
                pl.BlockSpec((1, tn), lambda i, j: (0, j)),
            ],
            out_specs=pl.BlockSpec((tm, tn), lambda i, j: (i, j)),
        ),
        compiler_params=pltpu.CompilerParams(
            dimension_semantics=("parallel", "arbitrary"),
            vmem_limit_bytes=_VMEM_LIMIT),
    )(x_p, w, b2)
    return out if Mp == M else out[:M]


# ----------------------------------------------------------------------------
# Flash-style causal attention reading the fused qkv buffer directly.
# qkv: (B, T, 3C); grid = (B, T//tq, T//tkv), kv axis innermost ("arbitrary").
# All heads are processed per grid step (static loop); per-head online-softmax
# state (m, l, acc) lives in VMEM scratch across the kv axis.
# ----------------------------------------------------------------------------
def _flash_kernel(q_ref, k_ref, v_ref, o_ref, m_ref, l_ref, acc_ref,
                  *, n_head, hs, tq, tkv, scale):
    qi = pl.program_id(1)
    ki = pl.program_id(2)
    q_start = qi * tq
    k_start = ki * tkv

    @pl.when(ki == 0)
    def _init():
        m_ref[...] = jnp.full_like(m_ref[...], MASK_VALUE)
        l_ref[...] = jnp.zeros_like(l_ref[...])
        acc_ref[...] = jnp.zeros_like(acc_ref[...])

    def _update(apply_mask):
        for h in range(n_head):
            sl = slice(h * hs, (h + 1) * hs)
            # scale = 1/sqrt(hs) * log2(e) folded into q: softmax computed with
            # exp2 (native EUP op) — the inner loop is EUP-bound at small hs.
            q_h = q_ref[0, :, sl] * scale                       # (tq, hs)
            k_h = k_ref[0, :, sl]                               # (tkv, hs)
            s = lax.dot_general(q_h, k_h, (((1,), (1,)), ((), ())),
                                preferred_element_type=jnp.float32)  # (tq, tkv)
            if apply_mask:
                row = q_start + lax.broadcasted_iota(jnp.int32, s.shape, 0)
                col = k_start + lax.broadcasted_iota(jnp.int32, s.shape, 1)
                s = jnp.where(col <= row, s, MASK_VALUE)
            m_prev = m_ref[h]                                   # (tq, 1)
            m_new = jnp.maximum(m_prev, jnp.max(s, axis=-1, keepdims=True))
            alpha = jnp.exp2(m_prev - m_new)
            p = jnp.exp2(s - m_new)
            l_ref[h] = alpha * l_ref[h] + jnp.sum(p, axis=-1, keepdims=True)
            v_h = v_ref[0, :, sl]                               # (tkv, hs)
            acc_ref[h] = alpha * acc_ref[h] + jnp.dot(
                p.astype(v_h.dtype), v_h, preferred_element_type=jnp.float32)
            m_ref[h] = m_new

    # Strictly below the causal diagonal (tq == tkv): no masking needed.
    @pl.when(ki < qi)
    def _interior():
        _update(apply_mask=False)

    # Diagonal tile: apply the causal mask.
    @pl.when(ki == qi)
    def _diagonal():
        _update(apply_mask=True)

    # ki > qi: fully above the diagonal — no compute; the kv index_map clamps
    # to min(ki, qi) so no fresh K/V DMA is issued either.
    # TODO(synk): flatten to a lower-triangular grid via scalar prefetch so
    # those steps don't exist at all (matters for long T).

    @pl.when(ki == pl.num_programs(2) - 1)
    def _finalize():
        outs = []
        for h in range(n_head):
            inv = pl.reciprocal(l_ref[h], approx=True)
            outs.append((acc_ref[h] * inv).astype(o_ref.dtype))
        o_ref[0] = jnp.concatenate(outs, axis=-1)               # (tq, C) lane-dense


def flash_attention_fused(qkv, n_head):
    """qkv: (B, T, 3C) fused projections -> (B, T, C) causal attention output."""
    B, T, C3 = qkv.shape
    C = C3 // 3
    hs = C // n_head
    t = _pick_tile(T, (512, 256, 128, 64))
    tq = tkv = t
    scale = (1.0 / (hs ** 0.5)) * LOG2E
    kernel = functools.partial(_flash_kernel, n_head=n_head, hs=hs,
                               tq=tq, tkv=tkv, scale=scale)
    grid = (B, T // tq, T // tkv)

    if C % 128 == 0:
        # q/k/v are column blocks 0/1/2 of the fused buffer: no wrapper-side
        # split or transpose, no extra HBM round trip.
        operands = (qkv, qkv, qkv)
        q_spec = pl.BlockSpec((1, tq, C), lambda b, qi, ki: (b, qi, 0))
        k_spec = pl.BlockSpec((1, tkv, C),
                              lambda b, qi, ki: (b, jnp.minimum(ki, qi), 1))
        v_spec = pl.BlockSpec((1, tkv, C),
                              lambda b, qi, ki: (b, jnp.minimum(ki, qi), 2))
    else:
        # Lane-alignment rule forbids a C-wide column block here (C not a
        # multiple of 128): fall back to one split; still no head transpose.
        q_all, k_all, v_all = jnp.split(qkv, 3, axis=-1)
        operands = (q_all, k_all, v_all)
        q_spec = pl.BlockSpec((1, tq, C), lambda b, qi, ki: (b, qi, 0))
        k_spec = pl.BlockSpec((1, tkv, C),
                              lambda b, qi, ki: (b, jnp.minimum(ki, qi), 0))
        v_spec = pl.BlockSpec((1, tkv, C),
                              lambda b, qi, ki: (b, jnp.minimum(ki, qi), 0))

    out_spec = pl.BlockSpec((1, tq, C), lambda b, qi, ki: (b, qi, 0))
    return pl.pallas_call(
        kernel,
        out_shape=jax.ShapeDtypeStruct((B, T, C), qkv.dtype),
        grid_spec=pltpu.PrefetchScalarGridSpec(
            num_scalar_prefetch=0,
            grid=grid,
            in_specs=[q_spec, k_spec, v_spec],
            out_specs=out_spec,
            scratch_shapes=[
                pltpu.VMEM((n_head, tq, 1), jnp.float32),    # running max (log2 domain)
                pltpu.VMEM((n_head, tq, 1), jnp.float32),    # running denom
                pltpu.VMEM((n_head, tq, hs), jnp.float32),   # unnormalized output
            ],
        ),
        compiler_params=pltpu.CompilerParams(
            dimension_semantics=("parallel", "parallel", "arbitrary"),
            vmem_limit_bytes=_VMEM_LIMIT),
    )(*operands)


# ----------------------------------------------------------------------------
# Full module forward (CausalSelfAttention, inference semantics)
# ----------------------------------------------------------------------------
def causal_self_attention(x, params, n_head):
    """x: (B, T, C). params: c_attn_w (C,3C), c_attn_b (3C,), c_proj_w (C,C),
    c_proj_b (C,)."""
    B, T, C = x.shape
    assert C % n_head == 0

    # Fused QKV projection over the flattened (B*T, C) activations.
    qkv = linear(x.reshape(B * T, C), params["c_attn_w"], params["c_attn_b"])

    # Attention reads the fused qkv buffer directly (no head transpose) and
    # writes (B, T, C) directly consumable by the output projection.
    y = flash_attention_fused(qkv.reshape(B, T, 3 * C), n_head)

    # TODO(synk): attn/resid dropout omitted (inference semantics, dropout_p=0).
    # TODO(synk): for v5e, cast activations/weights to bf16 in this wrapper
    # (keep f32 accumulation) for several-x faster MXU matmuls.
    out = linear(y.reshape(B * T, C), params["c_proj_w"], params["c_proj_b"])
    return out.reshape(B, T, C)


# ----------------------------------------------------------------------------
# Pure-JAX reference for verification (HIGHEST precision so the comparison is
# against f32-accurate math, matching the kernel's f32 accumulation).
# ----------------------------------------------------------------------------
def reference(x, params, n_head):
    B, T, C = x.shape
    hs = C // n_head
    prec = lax.Precision.HIGHEST
    qkv = jnp.dot(x, params["c_attn_w"], precision=prec) + params["c_attn_b"]
    q, k, v = jnp.split(qkv, 3, axis=2)
    q = q.reshape(B, T, n_head, hs).transpose(0, 2, 1, 3)
    k = k.reshape(B, T, n_head, hs).transpose(0, 2, 1, 3)
    v = v.reshape(B, T, n_head, hs).transpose(0, 2, 1, 3)
    s = jnp.einsum("bhqd,bhkd->bhqk", q, k, precision=prec) / (hs ** 0.5)
    mask = jnp.tril(jnp.ones((T, T), dtype=bool))
    s = jnp.where(mask, s, -jnp.inf)
    p = jax.nn.softmax(s, axis=-1)
    y = jnp.einsum("bhqk,bhkd->bhqd", p, v, precision=prec)
    y = y.transpose(0, 2, 1, 3).reshape(B, T, C)
    return jnp.dot(y, params["c_proj_w"], precision=prec) + params["c_proj_b"]


if __name__ == "__main__":
    def _check(B, T, C, n_head, tol):
        key = jax.random.PRNGKey(0)
        kx, k1, k2, k3, k4 = jax.random.split(key, 5)
        x = jax.random.normal(kx, (B, T, C), dtype=jnp.float32)
        params = {
            "c_attn_w": jax.random.normal(k1, (C, 3 * C), dtype=jnp.float32) * 0.02,
            "c_attn_b": jax.random.normal(k2, (3 * C,), dtype=jnp.float32) * 0.02,
            "c_proj_w": jax.random.normal(k3, (C, C), dtype=jnp.float32) * 0.02,
            "c_proj_b": jax.random.normal(k4, (C,), dtype=jnp.float32) * 0.02,
        }
        out = jax.block_until_ready(causal_self_attention(x, params, n_head))
        ref = reference(x, params, n_head)
        assert out.shape == (B, T, C)
        assert jnp.allclose(out, ref, atol=tol, rtol=tol), (
            f"mismatch vs reference at B={B} T={T} C={C} n_head={n_head}")

    # Small shapes: full-extent blocks, non-128-aligned-C fallback path.
    _check(B=2, T=8, C=32, n_head=4, tol=1e-3)
    # Multi-tile shapes: tiled linears, fused-qkv column-block path, causal
    # tile skipping across a 2x2 q/kv grid, per-head loop at hs=64.
    _check(B=2, T=1024, C=256, n_head=4, tol=1e-3)
    print("KERNEL_OK")
</pallas_src>

<mosaic_0001>
module attributes {stable_mosaic.version = 11 : i64} {
  func.func @_linear_kernel(%arg0: i32, %arg1: i32, %arg2: memref<16x32xf32, #tpu.memory_space<vmem>>, %arg3: memref<32x96xf32, #tpu.memory_space<vmem>>, %arg4: memref<1x96xf32, #tpu.memory_space<vmem>>, %arg5: memref<16x96xf32, #tpu.memory_space<vmem>>) attributes {dimension_semantics = [#tpu.dimension_semantics<parallel>, #tpu.dimension_semantics<arbitrary>], iteration_bounds = array<i64: 1, 1>, scalar_prefetch = 0 : i64, scratch_operands = 0 : i64, tpu.core_type = #tpu.core_type<tc>, window_params = [{transform_indices = @transform_0, window_bounds = array<i64: 16, 32>}, {transform_indices = @transform_1, window_bounds = array<i64: 32, 96>}, {transform_indices = @transform_2, window_bounds = array<i64: 1, 96>}, {transform_indices = @transform_3, window_bounds = array<i64: 16, 96>}]} {
    %c0 = arith.constant 0 : index
    %c0_0 = arith.constant 0 : index
    %0 = vector.load %arg2[%c0, %c0_0] : memref<16x32xf32, #tpu.memory_space<vmem>>, vector<16x32xf32>
    %c0_1 = arith.constant 0 : index
    %c0_2 = arith.constant 0 : index
    %1 = vector.load %arg3[%c0_1, %c0_2] : memref<32x96xf32, #tpu.memory_space<vmem>>, vector<32x96xf32>
    %cst = arith.constant dense<0.000000e+00> : vector<16x96xf32>
    %2 = tpu.matmul %0, %1, %cst {dimension_numbers = #tpu.dot_dimension_numbers<[1], [0], [0], [1], [0, 0, 1, 1], [], []>} : vector<16x32xf32>, vector<32x96xf32>, vector<16x96xf32> -> vector<16x96xf32>
    %c0_3 = arith.constant 0 : index
    %c0_4 = arith.constant 0 : index
    %3 = vector.load %arg4[%c0_3, %c0_4] : memref<1x96xf32, #tpu.memory_space<vmem>>, vector<1x96xf32>
    %4 = vector.broadcast %3 : vector<1x96xf32> to vector<16x96xf32>
    %5 = arith.addf %2, %4 : vector<16x96xf32>
    %c0_5 = arith.constant 0 : index
    %c0_6 = arith.constant 0 : index
    %6 = vector.load %arg5[%c0_5, %c0_6] : memref<16x96xf32, #tpu.memory_space<vmem>>, vector<16x96xf32>
    tpu.vector_store %arg5[%c0_5, %c0_6], %5 {strides = array<i32>} : memref<16x96xf32, #tpu.memory_space<vmem>>, vector<16x96xf32>,
    return
  }
  func.func @transform_0(%arg0: i32, %arg1: i32) -> (i32, i32) {
    %c0_i32 = arith.constant 0 : i32
    %c0_i32_0 = arith.constant 0 : i32
    return %arg0, %c0_i32 : i32, i32
  }
  func.func @transform_1(%arg0: i32, %arg1: i32) -> (i32, i32) {
    %c0_i32 = arith.constant 0 : i32
    %c0_i32_0 = arith.constant 0 : i32
    return %c0_i32, %arg1 : i32, i32
  }
  func.func @transform_2(%arg0: i32, %arg1: i32) -> (i32, i32) {
    %c0_i32 = arith.constant 0 : i32
    %c0_i32_0 = arith.constant 0 : i32
    return %c0_i32, %arg1 : i32, i32
  }
  func.func @transform_3(%arg0: i32, %arg1: i32) -> (i32, i32) {
    %c0_i32 = arith.constant 0 : i32
    return %arg0, %arg1 : i32, i32
  }
}

</mosaic_0001>

<bundles_post_ra>
// kernel: tpu_custom_call.1
= control target key start
LH: loop header
LB: loop body
LE: loop exit
PB: predicated region body
PF: predicated region fallthrough
CT: control target
= control target key end

     0   :  { %8 = vsyncpa [#allocation3], 0  ;;  %s246_s0 = inlined_call_operand.hbm [shape: f32[16,32], index: 0, kind: input, shape index: {}]   ;;  %s247_s1 = inlined_call_operand.hbm [shape: f32[32,96], index: 1, kind: input, shape index: {}]   ;;  %s248_s2 = inlined_call_operand.vmem [shape: f32[1,96], index: 2, kind: input, shape index: {}]   ;;  %s249_s3 = inlined_call_operand.hbm [shape: f32[16,96], index: 3, kind: output, shape index: {}]  }
   0x1   :  { %9 = vsyncpa [#allocation6], 0 }
   0x2   :  { %10 = vsyncpa [#allocation4], 0  ;;  %s15_s14 = sshll.u32 %s246_s0, 4  ;;  %s200_s15 = smov [#allocation2]   ;;  %s16_s14 = int_to_ptr.hbm [resolvable:$true] %s15_s14 }
   0x3   :  { %s17_s16 = sshll.u32 %s200_s15, 4  ;;  %s28_s19 = sshll.u32 %s247_s1, 4  ;;  %s18_s16 = int_to_ptr.vmem [resolvable:$true] %s17_s16  ;;  %s29_s19 = int_to_ptr.hbm [resolvable:$true] %s28_s19 }
   0x4   :  { %s201_s20 = smov 128   ;;  %s202_s21 = smov 8  }
   0x5   :  { %23 = dma.hbm_to_vmem [thread:$0]  %s16_s14, 256, %s18_s16, [#allocation3], %s201_s20, %s201_s20, %s202_s21  }
   0x6   :  { %s203_s22 = smov [#allocation5]  }
   0x7   :  { %s30_s23 = sshll.u32 %s203_s22, 4  ;;  %s31_s23 = int_to_ptr.vmem [resolvable:$true] %s30_s23 }
   0x8   :  { %36 = dma.hbm_to_vmem [thread:$0]  %s29_s19, 512, %s31_s23, [#allocation6], %s201_s20, %s201_s20, %s202_s21  }
   0x9   :  { %194 = dma.done.wait [#allocation3], 256  }
   0xa   :  { %195 = vsyncadd [#allocation3], 4294967040 }
   0xb   :  { %196 = dma.done.wait [#allocation6], 512  }
   0xc   :  { %197 = vsyncadd [#allocation6], 4294966784  ;;  %v52_v0 = vld [vmem:[#allocation5 + $0x18] sm:$0xff]  ;;  %v51_v1 = vld [vmem:[#allocation5 + $0x10] sm:$0xff]  ;;  %vm57_vm0 = vcmask 261120   ;;  %s204_s24 = smov [#allocation7]  }
   0xd   :  { %76 = vmatpush.msra.mxu0 %v52_v0  ;;  %112 = vmatpush.msra.mxu1 %v52_v0  ;;  %v50_v2 = vld [vmem:[#allocation5 + $0x8] sm:$0xff]  ;;  %v49_v3 = vld [vmem:[#allocation5] sm:$0xff]  ;;  %v47_v4 = vld [vmem:[#allocation2] sm:$0xff]  ;;  %s94_s25 = sshll.u32 %s204_s24, 4  ;;  %s96_s28 = sshll.u32 %s249_s3, 4  ;;  %vm87_vm1 = vcmask 785408   ;;  %s95_s25 = int_to_ptr.vmem [resolvable:$true] %s94_s25  ;;  %s97_s28 = int_to_ptr.hbm [resolvable:$true] %s96_s28 }
   0xe   :  { %v48_v5 = vld [vmem:[#allocation2 + $0x8] sm:$0xff]  ;;  %v121_v6 = vld [vmem:[%s248_s2] ss:$0 sm:$0xff] }
   0xf   :  { %77 = vmatpush.msra.mxu0 %v51_v1  ;;  %113 = vmatpush.msra.mxu1 %v51_v1 }
  0x11   :  { %78 = vmatpush.msra.mxu0 %v50_v2  ;;  %114 = vmatpush.msra.mxu1 %v50_v2 }
  0x13   :  { %79 = vmatpush.msra.mxu0 %v49_v3  ;;  %115 = vmatpush.msra.mxu1 %v49_v3 }
  0x14   :  { %110 = vmatmul.msk.f32.vlgmr.msra.gmra.mxu0 %vm57_vm0, %v47_v4  ;;  %111 = vmatmul.msk.f32.vlgmr.msra.gmra.mxu1 %vm57_vm0, %v48_v5 }
  0x91   :  { %v81_v7 = vpop.f32.mrf.mxu0  ;;  %v84_v8 = vpop.f32.mrf.mxu1 }
  0x92   :  { %v82_v9 = vadd.f32 %v121_v6, %v81_v7  ;;  %v85_v10 = vadd.f32 %v121_v6, %v84_v8 }
  0x94   :  { %88 = vst.msk [vmem:[#allocation7] sm:$0xff] %vm87_vm1, %v82_v9 }
  0x95   :  { %89 = vst.msk [vmem:[#allocation7 + $0x8] sm:$0xff] %vm87_vm1, %v85_v10 }
  0x96   :  { %102 = dma.vmem_to_hbm [thread:$0]  %s95_s25, 256, %s97_s28, [#allocation4], %s201_s20, %s201_s20, %s202_s21  }
  0x97   :  { %198 = dma.done.wait [#allocation4], 256  }
  0x98   :  { %199 = vsyncadd [#allocation4], 4294967040 }
  0x99   :  { %107 = vsyncpa [#allocation3], 1 }
  0x9a   :  { %108 = vsyncpa [#allocation6], 1 }
  0x9b   :  { %109 = vsyncpa [#allocation4], 1 }

</bundles_post_ra>
